<compile_context>
chip_gen: v7x
topology: tpu7x:2x2x1
jax: 0.10.0
libtpu: 0.0.40
codegen_flags: <defaults>
</compile_context>

<pallas_src>
from functools import partial

import jax
import jax.numpy as jnp
from jax.experimental import pallas as pl
from jax.experimental.pallas import tpu as pltpu

_LANE = 128
_SUBLANE = 8
_MEGACORE_SPLIT_ROWS = 1024   # split batch into >=2 tiles above this (v7x megacore)


def _round_up(n, m):
    return ((n + m - 1) // m) * m


def dqn_kernel(x_ref, w1_ref, b1_ref, w2_ref, b2_ref, w3_ref, b3_ref, o_ref):
    # Whole MLP hot path: 3 MXU matmuls (f32 accumulation) + f32 VPU bias/ReLU epilogue.
    mxu_dtype = w1_ref.dtype                      # f32 or bf16 (chosen in prepare_dqn_params)
    x = x_ref[...].astype(mxu_dtype)
    h1 = jnp.dot(x, w1_ref[...], preferred_element_type=jnp.float32) + b1_ref[...]
    h1 = jnp.maximum(h1, 0.0)                     # f32 elementwise (v5e-safe)
    h2 = jnp.dot(h1.astype(mxu_dtype), w2_ref[...],
                 preferred_element_type=jnp.float32) + b2_ref[...]
    h2 = jnp.maximum(h2, 0.0)
    # Final projection writes the UNPADDED (tb, out_dim) block -> minimal HBM writeback.
    o_ref[...] = jnp.dot(h2.astype(mxu_dtype), w3_ref[...],
                         preferred_element_type=jnp.float32) + b3_ref[...]


def prepare_dqn_params(params, *, use_bf16=True):
    """One-time prep: lane-pad the hidden dim to 128 and (optionally) cast MXU operands
    to bf16.  Biases stay f32 (f32 epilogue).  The output feature dim is NOT padded."""
    w1, b1, w2, b2, w3, b3 = params
    hidden = w1.shape[1]
    hp = _round_up(hidden, _LANE)

    w1p = jnp.pad(w1, ((0, 0), (0, hp - hidden)))
    b1p = jnp.pad(jnp.reshape(b1, (1, -1)), ((0, 0), (0, hp - hidden)))
    w2p = jnp.pad(w2, ((0, hp - hidden), (0, hp - hidden)))
    b2p = jnp.pad(jnp.reshape(b2, (1, -1)), ((0, 0), (0, hp - hidden)))
    w3p = jnp.pad(w3, ((0, hp - hidden), (0, 0)))          # out_dim left unpadded
    b3p = jnp.reshape(b3, (1, -1))

    if use_bf16:
        # Narrow only the MXU operands; accumulation / bias / ReLU stay f32.
        w1p = w1p.astype(jnp.bfloat16)
        w2p = w2p.astype(jnp.bfloat16)
        w3p = w3p.astype(jnp.bfloat16)
    return (w1p, b1p, w2p, b2p, w3p, b3p)


@partial(jax.jit, static_argnames=("tile_b",))
def dqn_forward(x, prepared_params, *, tile_b=2048):
    w1p, b1p, w2p, b2p, w3p, b3p = prepared_params
    batch, in_dim = x.shape
    out_dim = w3p.shape[1]
    mxu_dtype = w1p.dtype

    # ---- Batch tiling: tile multiple of 8 sublanes; batch padded to a tile multiple.
    padded_batch = _round_up(batch, _SUBLANE)
    if padded_batch >= _MEGACORE_SPLIT_ROWS:
        # Keep >= 2 "parallel" grid steps so v7x can shard across both TensorCores.
        tb = min(tile_b, _round_up(pl.cdiv(padded_batch, 2), _SUBLANE))
    else:
        tb = min(tile_b, padded_batch)
    tb = _round_up(tb, _SUBLANE)
    bp = _round_up(batch, tb)

    xp = jnp.pad(x, ((0, bp - batch), (0, 0))).astype(mxu_dtype)

    def resident(shape):
        # Constant block index -> weight/bias stays VMEM-resident across grid steps.
        return pl.BlockSpec(shape, lambda i: (0, 0))

    out = pl.pallas_call(
        dqn_kernel,
        out_shape=jax.ShapeDtypeStruct((bp, out_dim), jnp.float32),
        grid_spec=pl.GridSpec(
            grid=(bp // tb,),
            in_specs=[
                pl.BlockSpec((tb, in_dim), lambda i: (i, 0)),   # x: pipelined over batch
                resident(w1p.shape), resident(b1p.shape),
                resident(w2p.shape), resident(b2p.shape),
                resident(w3p.shape), resident(b3p.shape),
            ],
            out_specs=pl.BlockSpec((tb, out_dim), lambda i: (i, 0)),  # unpadded lanes
        ),
        compiler_params=pltpu.CompilerParams(
            dimension_semantics=("parallel",),  # megacore sharding on v7x
        ),
    )(xp, w1p, b1p, w2p, b2p, w3p, b3p)

    return out[:batch]


def init_dqn_params(key, input_dim, output_dim, hidden=24):
    """Deterministic init mimicking PyTorch nn.Linear default (U(-1/sqrt(fan_in), +))."""
    ks = jax.random.split(key, 6)

    def linear(kw, kb, fan_in, fan_out):
        bound = 1.0 / jnp.sqrt(jnp.float32(fan_in))
        w = jax.random.uniform(kw, (fan_in, fan_out), jnp.float32, -bound, bound)
        b = jax.random.uniform(kb, (1, fan_out), jnp.float32, -bound, bound)
        return w, b

    w1, b1 = linear(ks[0], ks[1], input_dim, hidden)
    w2, b2 = linear(ks[2], ks[3], hidden, hidden)
    w3, b3 = linear(ks[4], ks[5], hidden, output_dim)
    return (w1, b1, w2, b2, w3, b3)


def dqn_reference(x, params):
    w1, b1, w2, b2, w3, b3 = params
    h1 = jnp.maximum(x @ w1 + b1, 0.0)
    h2 = jnp.maximum(h1 @ w2 + b2, 0.0)
    return h2 @ w3 + b3


if __name__ == "__main__":
    key = jax.random.PRNGKey(0)
    k_x, k_p, k_x2 = jax.random.split(key, 3)

    batch, input_dim, output_dim = 2, 8, 4
    params = init_dqn_params(k_p, input_dim, output_dim)

    # --- exact f32 path, tiny batch (single grid step, padded to 8 rows) ---
    prepared_f32 = prepare_dqn_params(params, use_bf16=False)
    x = jax.random.normal(k_x, (batch, input_dim), dtype=jnp.float32)
    out = jax.block_until_ready(dqn_forward(x, prepared_f32))
    ref = dqn_reference(x, params)
    assert out.shape == (batch, output_dim)
    assert jnp.allclose(out, ref, atol=1e-4, rtol=1e-4)

    # --- large batch: exercises the multi-tile "parallel" grid + padding slices, f32 ---
    big_batch = 5000
    x_big = jax.random.normal(k_x2, (big_batch, input_dim), dtype=jnp.float32)
    out_big = jax.block_until_ready(dqn_forward(x_big, prepared_f32))
    ref_big = dqn_reference(x_big, params)
    assert out_big.shape == (big_batch, output_dim)
    assert jnp.allclose(out_big, ref_big, atol=1e-4, rtol=1e-4)

    # --- default bf16-MXU-operand path (halved x/weight DMA on all chips), f32 accum ---
    prepared_bf16 = prepare_dqn_params(params)          # use_bf16=True is the default
    out_bf16 = jax.block_until_ready(dqn_forward(x_big, prepared_bf16))
    assert out_bf16.shape == (big_batch, output_dim)
    assert jnp.allclose(out_bf16, ref_big, atol=3e-2, rtol=3e-2)

    print("KERNEL_OK")
</pallas_src>

<mosaic_0001>
module attributes {stable_mosaic.version = 11 : i64} {
  func.func @dqn_kernel(%arg0: i32, %arg1: memref<8x8xf32, #tpu.memory_space<vmem>>, %arg2: memref<8x128xf32, #tpu.memory_space<vmem>>, %arg3: memref<1x128xf32, #tpu.memory_space<vmem>>, %arg4: memref<128x128xf32, #tpu.memory_space<vmem>>, %arg5: memref<1x128xf32, #tpu.memory_space<vmem>>, %arg6: memref<128x4xf32, #tpu.memory_space<vmem>>, %arg7: memref<1x4xf32, #tpu.memory_space<vmem>>, %arg8: memref<8x4xf32, #tpu.memory_space<vmem>>) attributes {dimension_semantics = [#tpu.dimension_semantics<parallel>], iteration_bounds = array<i64: 1>, scalar_prefetch = 0 : i64, scratch_operands = 0 : i64, tpu.core_type = #tpu.core_type<tc>, window_params = [{transform_indices = @transform_0, window_bounds = array<i64: 8, 8>}, {pipeline_mode = #tpu.pipeline_mode<synchronous>, transform_indices = @transform_1, window_bounds = array<i64: 8, 128>}, {pipeline_mode = #tpu.pipeline_mode<synchronous>, transform_indices = @transform_2, window_bounds = array<i64: 1, 128>}, {pipeline_mode = #tpu.pipeline_mode<synchronous>, transform_indices = @transform_3, window_bounds = array<i64: 128, 128>}, {pipeline_mode = #tpu.pipeline_mode<synchronous>, transform_indices = @transform_4, window_bounds = array<i64: 1, 128>}, {pipeline_mode = #tpu.pipeline_mode<synchronous>, transform_indices = @transform_5, window_bounds = array<i64: 128, 4>}, {pipeline_mode = #tpu.pipeline_mode<synchronous>, transform_indices = @transform_6, window_bounds = array<i64: 1, 4>}, {transform_indices = @transform_7, window_bounds = array<i64: 8, 4>}]} {
    %c0 = arith.constant 0 : index
    %c0_0 = arith.constant 0 : index
    %0 = vector.load %arg1[%c0, %c0_0] : memref<8x8xf32, #tpu.memory_space<vmem>>, vector<8x8xf32>
    %c0_1 = arith.constant 0 : index
    %c0_2 = arith.constant 0 : index
    %1 = vector.load %arg2[%c0_1, %c0_2] : memref<8x128xf32, #tpu.memory_space<vmem>>, vector<8x128xf32>
    %cst = arith.constant dense<0.000000e+00> : vector<8x128xf32>
    %2 = tpu.matmul %0, %1, %cst {dimension_numbers = #tpu.dot_dimension_numbers<[1], [0], [0], [1], [0, 0, 1, 1], [], []>} : vector<8x8xf32>, vector<8x128xf32>, vector<8x128xf32> -> vector<8x128xf32>
    %c0_3 = arith.constant 0 : index
    %c0_4 = arith.constant 0 : index
    %3 = vector.load %arg3[%c0_3, %c0_4] : memref<1x128xf32, #tpu.memory_space<vmem>>, vector<1x128xf32>
    %4 = vector.broadcast %3 : vector<1x128xf32> to vector<8x128xf32>
    %5 = arith.addf %2, %4 : vector<8x128xf32>
    %cst_5 = arith.constant 0.000000e+00 : f32
    %6 = vector.broadcast %cst_5 : f32 to vector<8x128xf32>
    %7 = arith.maximumf %5, %6 : vector<8x128xf32>
    %c0_6 = arith.constant 0 : index
    %c0_7 = arith.constant 0 : index
    %8 = vector.load %arg4[%c0_6, %c0_7] : memref<128x128xf32, #tpu.memory_space<vmem>>, vector<128x128xf32>
    %cst_8 = arith.constant dense<0.000000e+00> : vector<8x128xf32>
    %9 = tpu.matmul %7, %8, %cst_8 {dimension_numbers = #tpu.dot_dimension_numbers<[1], [0], [0], [1], [0, 0, 1, 1], [], []>} : vector<8x128xf32>, vector<128x128xf32>, vector<8x128xf32> -> vector<8x128xf32>
    %c0_9 = arith.constant 0 : index
    %c0_10 = arith.constant 0 : index
    %10 = vector.load %arg5[%c0_9, %c0_10] : memref<1x128xf32, #tpu.memory_space<vmem>>, vector<1x128xf32>
    %11 = vector.broadcast %10 : vector<1x128xf32> to vector<8x128xf32>
    %12 = arith.addf %9, %11 : vector<8x128xf32>
    %cst_11 = arith.constant 0.000000e+00 : f32
    %13 = vector.broadcast %cst_11 : f32 to vector<8x128xf32>
    %14 = arith.maximumf %12, %13 : vector<8x128xf32>
    %c0_12 = arith.constant 0 : index
    %c0_13 = arith.constant 0 : index
    %15 = vector.load %arg6[%c0_12, %c0_13] : memref<128x4xf32, #tpu.memory_space<vmem>>, vector<128x4xf32>
    %cst_14 = arith.constant dense<0.000000e+00> : vector<8x4xf32>
    %16 = tpu.matmul %14, %15, %cst_14 {dimension_numbers = #tpu.dot_dimension_numbers<[1], [0], [0], [1], [0, 0, 1, 1], [], []>} : vector<8x128xf32>, vector<128x4xf32>, vector<8x4xf32> -> vector<8x4xf32>
    %c0_15 = arith.constant 0 : index
    %c0_16 = arith.constant 0 : index
    %17 = vector.load %arg7[%c0_15, %c0_16] : memref<1x4xf32, #tpu.memory_space<vmem>>, vector<1x4xf32>
    %18 = vector.broadcast %17 : vector<1x4xf32> to vector<8x4xf32>
    %19 = arith.addf %16, %18 : vector<8x4xf32>
    %c0_17 = arith.constant 0 : index
    %c0_18 = arith.constant 0 : index
    %20 = vector.load %arg8[%c0_17, %c0_18] : memref<8x4xf32, #tpu.memory_space<vmem>>, vector<8x4xf32>
    tpu.vector_store %arg8[%c0_17, %c0_18], %19 {strides = array<i32>} : memref<8x4xf32, #tpu.memory_space<vmem>>, vector<8x4xf32>,
    return
  }
  func.func @transform_0(%arg0: i32) -> (i32, i32) {
    %c0_i32 = arith.constant 0 : i32
    %c0_i32_0 = arith.constant 0 : i32
    return %arg0, %c0_i32 : i32, i32
  }
  func.func @transform_1(%arg0: i32) -> (i32, i32) {
    %c0_i32 = arith.constant 0 : i32
    %c0_i32_0 = arith.constant 0 : i32
    %c0_i32_1 = arith.constant 0 : i32
    return %c0_i32, %c0_i32_0 : i32, i32
  }
  func.func @transform_2(%arg0: i32) -> (i32, i32) {
    %c0_i32 = arith.constant 0 : i32
    %c0_i32_0 = arith.constant 0 : i32
    %c0_i32_1 = arith.constant 0 : i32
    return %c0_i32, %c0_i32_0 : i32, i32
  }
  func.func @transform_3(%arg0: i32) -> (i32, i32) {
    %c0_i32 = arith.constant 0 : i32
    %c0_i32_0 = arith.constant 0 : i32
    %c0_i32_1 = arith.constant 0 : i32
    return %c0_i32, %c0_i32_0 : i32, i32
  }
  func.func @transform_4(%arg0: i32) -> (i32, i32) {
    %c0_i32 = arith.constant 0 : i32
    %c0_i32_0 = arith.constant 0 : i32
    %c0_i32_1 = arith.constant 0 : i32
    return %c0_i32, %c0_i32_0 : i32, i32
  }
  func.func @transform_5(%arg0: i32) -> (i32, i32) {
    %c0_i32 = arith.constant 0 : i32
    %c0_i32_0 = arith.constant 0 : i32
    %c0_i32_1 = arith.constant 0 : i32
    return %c0_i32, %c0_i32_0 : i32, i32
  }
  func.func @transform_6(%arg0: i32) -> (i32, i32) {
    %c0_i32 = arith.constant 0 : i32
    %c0_i32_0 = arith.constant 0 : i32
    %c0_i32_1 = arith.constant 0 : i32
    return %c0_i32, %c0_i32_0 : i32, i32
  }
  func.func @transform_7(%arg0: i32) -> (i32, i32) {
    %c0_i32 = arith.constant 0 : i32
    %c0_i32_0 = arith.constant 0 : i32
    return %arg0, %c0_i32 : i32, i32
  }
}

</mosaic_0001>

<bundles_post_ra>
// kernel: dqn_forward.1
= control target key start
LH: loop header
LB: loop body
LE: loop exit
PB: predicated region body
PF: predicated region fallthrough
CT: control target
= control target key end

     0   :  { %vm35_vm0 = vcmask 64512   ;;  %v469_v0 = vmov 0.0   ;;  %vm470_vm1 = vmmov 0   ;;  %v471_v4 = vmov 0.0|0.0   ;;  %s642_s1 = inlined_call_operand.vmem [shape: f32[8,128], index: 1, kind: input, shape index: {}]   ;;  %s643_s0 = inlined_call_operand.vmem [shape: f32[8,8], index: 0, kind: input, shape index: {}]   ;;  %s644_s3 = inlined_call_operand.vmem [shape: f32[128,128], index: 3, kind: input, shape index: {}]   ;;  %s645_s5 = inlined_call_operand.vmem [shape: f32[128,4], index: 5, kind: input, shape index: {}]   ;;  %s646_s2 = inlined_call_operand.vmem [shape: f32[1,128], index: 2, kind: input, shape index: {}]   ;;  %s647_s4 = inlined_call_operand.vmem [shape: f32[1,128], index: 4, kind: input, shape index: {}]   ;;  %s648_s6 = inlined_call_operand.vmem [shape: f32[1,4], index: 6, kind: input, shape index: {}]   ;;  %s649_s7 = inlined_call_operand.vmem [shape: f32[8,4], index: 7, kind: output, shape index: {}]  }
   0x1   :  { %343 = vmatprep.subr.mxu0 %v469_v0  ;;  %v27_v1 = vld [vmem:[%s642_s1] sm:$0xff]  ;;  %345 = vmatprep.mubr.msk.f32.mxu0 %vm470_vm1, %v469_v0  ;;  %v111_v5 = vld [vmem:[%s644_s3 + $0x8] sm:$0xff]  ;;  %v112_v6 = vld [vmem:[%s644_s3 + $0x10] sm:$0xff]  ;;  %vm297_vm2 = vcmask 31744  }
   0x2   :  { %v26_v2 = vld [vmem:[%s643_s0] sm:$0xff]  ;;  %344 = vmatpush3.msra.mxu0 %v27_v1  ;;  %418 = vmatprep.subr.bf16.mxu1 %v471_v4  ;;  %v113_v7 = vld [vmem:[%s644_s3 + $0x18] sm:$0xff]  ;;  %v115_v11 = vld [vmem:[%s644_s3 + $0x28] sm:$0xff] }
   0x3   :  { %v110_v3 = vld [vmem:[%s644_s3] sm:$0xff]  ;;  %346 = vmatmul.mubr.msk.f32.vlgmr.msra.gmra.mrb[0].mxu0 %vm35_vm0, %v26_v2  ;;  %380 = vmatprep.mubr.msk.f32.mxu1 %vm470_vm1, %v469_v0  ;;  %v422_v9 = vpack.c.bf16 %v113_v7, %v112_v6  ;;  %v116_v13 = vld [vmem:[%s644_s3 + $0x30] sm:$0xff]  ;;  %v117_v14 = vld [vmem:[%s644_s3 + $0x38] sm:$0xff] }
   0x4   :  { %v419_v8 = vpack.c.bf16 %v111_v5, %v110_v3  ;;  %442 = vmatprep.subr.bf16.mxu0 %v471_v4  ;;  %415 = vmatprep.mubr.msk.f32.mxu0 %vm470_vm1, %v469_v0  ;;  %v114_v10 = vld [vmem:[%s644_s3 + $0x20] sm:$0xff]  ;;  %v428_v15 = vpack.c.bf16 %v117_v14, %v116_v13  ;;  %v119_v17 = vld [vmem:[%s644_s3 + $0x48] sm:$0xff]  ;;  %v120_v19 = vld [vmem:[%s644_s3 + $0x50] sm:$0xff] }
   0x5   :  { %v425_v12 = vpack.c.bf16 %v115_v11, %v114_v10  ;;  %v118_v16 = vld [vmem:[%s644_s3 + $0x40] sm:$0xff]  ;;  %v121_v20 = vld [vmem:[%s644_s3 + $0x58] sm:$0xff]  ;;  %v123_v23 = vld [vmem:[%s644_s3 + $0x68] sm:$0xff] }
   0x6   :  { %420 = vmatpush3.bf16.msra.mxu1 %v419_v8  ;;  %v431_v18 = vpack.c.bf16 %v119_v17, %v118_v16  ;;  %v434_v21 = vpack.c.bf16 %v121_v20, %v120_v19  ;;  %v122_v22 = vld [vmem:[%s644_s3 + $0x60] sm:$0xff]  ;;  %v124_v25 = vld [vmem:[%s644_s3 + $0x70] sm:$0xff]  ;;  %v125_v26 = vld [vmem:[%s644_s3 + $0x78] sm:$0xff] }
   0x7   :  { %421 = vmatprep.subr.bf16.mxu1 %v471_v4  ;;  %v437_v24 = vpack.c.bf16 %v123_v23, %v122_v22  ;;  %v440_v27 = vpack.c.bf16 %v125_v26, %v124_v25  ;;  %v204_v28 = vld [vmem:[%s645_s5] sm:$0xff]  ;;  %v205_v29 = vld [vmem:[%s645_s5 + $0x8] sm:$0xff]  ;;  %v206_v30 = vld [vmem:[%s645_s5 + $0x10] sm:$0xff] }
   0x8   :  { %v443_v31 = vpack.c.bf16 %v205_v29, %v204_v28  ;;  %v207_v32 = vld [vmem:[%s645_s5 + $0x18] sm:$0xff]  ;;  %v208_v34 = vld [vmem:[%s645_s5 + $0x20] sm:$0xff]  ;;  %v209_v35 = vld [vmem:[%s645_s5 + $0x28] sm:$0xff] }
   0x9   :  { %v446_v33 = vpack.c.bf16 %v207_v32, %v206_v30  ;;  %v449_v36 = vpack.c.bf16 %v209_v35, %v208_v34  ;;  %v210_v37 = vld [vmem:[%s645_s5 + $0x30] sm:$0xff]  ;;  %v211_v38 = vld [vmem:[%s645_s5 + $0x38] sm:$0xff]  ;;  %v212_v40 = vld [vmem:[%s645_s5 + $0x40] sm:$0xff] }
   0xa   :  { %423 = vmatpush3.bf16.msra.mxu1 %v422_v9  ;;  %444 = vmatpush3.bf16.msra.mxu0 %v443_v31  ;;  %v452_v39 = vpack.c.bf16 %v211_v38, %v210_v37  ;;  %v213_v41 = vld [vmem:[%s645_s5 + $0x48] sm:$0xff]  ;;  %v214_v43 = vld [vmem:[%s645_s5 + $0x50] sm:$0xff]  ;;  %v215_v44 = vld [vmem:[%s645_s5 + $0x58] sm:$0xff] }
   0xb   :  { %424 = vmatprep.subr.bf16.mxu1 %v471_v4  ;;  %445 = vmatprep.subr.bf16.mxu0 %v471_v4  ;;  %v455_v42 = vpack.c.bf16 %v213_v41, %v212_v40  ;;  %v458_v45 = vpack.c.bf16 %v215_v44, %v214_v43  ;;  %v216_v46 = vld [vmem:[%s645_s5 + $0x60] sm:$0xff]  ;;  %v217_v47 = vld [vmem:[%s645_s5 + $0x68] sm:$0xff]  ;;  %v218_v54 = vld [vmem:[%s645_s5 + $0x70] sm:$0xff] }
   0xc   :  { %v461_v48 = vpack.c.bf16 %v217_v47, %v216_v46  ;;  %v303_v49 = vld [vmem:[%s646_s2] ss:$0 sm:$0xff]  ;;  %v219_v55 = vld [vmem:[%s645_s5 + $0x78] sm:$0xff] }
   0xd   :  { %v464_v56 = vpack.c.bf16 %v219_v55, %v218_v54  ;;  %v305_v57 = vld [vmem:[%s647_s4] ss:$0 sm:$0xff] }
   0xe   :  { %426 = vmatpush3.bf16.msra.mxu1 %v425_v12  ;;  %447 = vmatpush3.bf16.msra.mxu0 %v446_v33  ;;  %v306_v62 = vld [vmem:[%s648_s6] ss:$0 sm:$0xff] }
   0xf   :  { %427 = vmatprep.subr.bf16.mxu1 %v471_v4  ;;  %448 = vmatprep.subr.bf16.mxu0 %v471_v4 }
  0x12   :  { %429 = vmatpush3.bf16.msra.mxu1 %v428_v15  ;;  %450 = vmatpush3.bf16.msra.mxu0 %v449_v36 }
  0x13   :  { %430 = vmatprep.subr.bf16.mxu1 %v471_v4  ;;  %451 = vmatprep.subr.bf16.mxu0 %v471_v4 }
  0x16   :  { %432 = vmatpush3.bf16.msra.mxu1 %v431_v18  ;;  %453 = vmatpush3.bf16.msra.mxu0 %v452_v39 }
  0x17   :  { %433 = vmatprep.subr.bf16.mxu1 %v471_v4  ;;  %454 = vmatprep.subr.bf16.mxu0 %v471_v4 }
  0x1a   :  { %435 = vmatpush3.bf16.msra.mxu1 %v434_v21  ;;  %456 = vmatpush3.bf16.msra.mxu0 %v455_v42 }
  0x1b   :  { %436 = vmatprep.subr.bf16.mxu1 %v471_v4  ;;  %457 = vmatprep.subr.bf16.mxu0 %v471_v4 }
  0x1e   :  { %438 = vmatpush3.bf16.msra.mxu1 %v437_v24  ;;  %459 = vmatpush3.bf16.msra.mxu0 %v458_v45 }
  0x1f   :  { %439 = vmatprep.subr.bf16.mxu1 %v471_v4  ;;  %460 = vmatprep.subr.bf16.mxu0 %v471_v4 }
  0x22   :  { %441 = vmatpush3.bf16.msra.mxu1 %v440_v27  ;;  %462 = vmatpush3.bf16.msra.mxu0 %v461_v48 }
  0x23   :  { %463 = vmatprep.subr.bf16.mxu0 %v471_v4 }
  0x26   :  { %465 = vmatpush3.bf16.msra.mxu0 %v464_v56 }
  0xd6   :  { %v105_v50 = vpop.f32.mrb[0].mxu0 }
  0xd7   :  { %v106_v51 = vadd.f32 %v303_v49, %v105_v50  ;;  %v347_v52 = vpop.f32.mrb[1].mxu0 }
  0xd9   :  { %v109_v53 = vmax.f32 %v106_v51, 0.0 }
  0xdb   :  { %381 = vmatmul.mubr.f32.vlgmr.msra.gmra.mrb[0].mxu1 %v109_v53 }
 0x1ae   :  { %v199_v58 = vpop.f32.mrb[0].mxu1 }
 0x1af   :  { %v200_v59 = vadd.f32 %v305_v57, %v199_v58  ;;  %v382_v60 = vpop.f32.mrb[1].mxu1 }
 0x1b1   :  { %v203_v61 = vmax.f32 %v200_v59, 0.0 }
 0x1b3   :  { %416 = vmatmul.mubr.f32.vlgmr.msra.gmra.mrb[2].mxu0 %v203_v61 }
 0x286   :  { %v293_v63 = vpop.f32.mrb[2].mxu0 }
 0x287   :  { %v294_v0 = vadd.f32 %v306_v62, %v293_v63  ;;  %v417_v1 = vpop.f32.mrb[3].mxu0 }
 0x289   :  { %298 = vst.msk [vmem:[%s649_s7] sm:$0xff] %vm297_vm2, %v294_v0 }

</bundles_post_ra>
